<compile_context>
chip_gen: v7x
topology: tpu7x:2x2x1
jax: 0.10.0
libtpu: 0.0.40
codegen_flags: <defaults>
</compile_context>

<pallas_src>
import functools

import jax
import jax.numpy as jnp
from jax.experimental import pallas as pl
from jax.experimental.pallas import tpu as pltpu

LEAKY_SLOPE = 0.1
BN_EPS = 1e-5
ACT_DTYPE = jnp.bfloat16            # inter-layer activation dtype (halves HBM traffic)
VMEM_LIMIT = 32 * 1024 * 1024       # safe on v5e/v6e (128 MiB) and v7x (64 MiB)


def _round_up(x, m):
    return (x + m - 1) // m * m


def _pick_tile(dim, candidates):
    for c in candidates:
        if dim % c == 0:
            return c
    return candidates[-1]


# ----------------------------------------------------------------------------
# Pallas kernel: tiled matmul (bf16 MXU, f32 acc) + bias (+ LeakyReLU) (+ residual)
# This implements conv (via im2col), folded BN and activation in one fused kernel.
# ----------------------------------------------------------------------------
def _conv_mm_kernel(x_ref, w_ref, b_ref, *rest, act, has_res):
    if has_res:
        r_ref, o_ref, acc_ref = rest
    else:
        o_ref, acc_ref = rest
        r_ref = None

    @pl.when(pl.program_id(2) == 0)
    def _init():
        acc_ref[...] = jnp.zeros_like(acc_ref)

    acc_ref[...] += jnp.dot(x_ref[...], w_ref[...],
                            preferred_element_type=jnp.float32)

    @pl.when(pl.program_id(2) == pl.num_programs(2) - 1)
    def _finalize():
        y = acc_ref[...] + b_ref[...]           # BN scale already folded into w
        if act:                                  # LeakyReLU(0.1), f32 epilogue
            y = jnp.where(y > 0, y, LEAKY_SLOPE * y)
        if has_res:                              # fused residual add (post-activation)
            y = y + r_ref[...].astype(jnp.float32)
        o_ref[...] = y.astype(o_ref.dtype)


def matmul_bias_act(x, wmat, bias, *, act, n_valid, residual=None,
                    out_dtype=ACT_DTYPE):
    """(M,K) @ (Kp,Np) on the MXU (bf16 in / f32 acc), + bias, LeakyReLU, residual."""
    M, K = x.shape
    Kp, Np = wmat.shape

    Mp = _round_up(M, 8)
    tm = _pick_tile(Mp, (512, 256, 128, 64, 32, 16, 8))
    tk = _pick_tile(Kp, (512, 384, 256, 128))
    tn = _pick_tile(Np, (512, 256, 128))
    # Keep >= 2 output blocks when a layer has a single M tile (dual-TC chips).
    if Mp // tm == 1 and Np // tn == 1 and Np % 256 == 0:
        tn = Np // 2

    if (Mp, Kp) != (M, K):
        x = jnp.pad(x, ((0, Mp - M), (0, Kp - K)))
    x = x.astype(jnp.bfloat16)

    inputs = [x, wmat, bias]
    in_specs = [
        pl.BlockSpec((tm, tk), lambda i, j, k: (i, k)),
        pl.BlockSpec((tk, tn), lambda i, j, k: (k, j)),
        pl.BlockSpec((1, tn), lambda i, j, k: (0, j)),
    ]
    has_res = residual is not None
    if has_res:
        r = residual
        if r.shape != (Mp, Np):
            r = jnp.pad(r, ((0, Mp - r.shape[0]), (0, Np - r.shape[1])))
        inputs.append(r.astype(jnp.bfloat16))
        in_specs.append(pl.BlockSpec((tm, tn), lambda i, j, k: (i, j)))

    grid = (Mp // tm, Np // tn, Kp // tk)

    out_bytes = jnp.dtype(out_dtype).itemsize
    bytes_accessed = (Mp * Kp * 2 + Kp * Np * 2 + Np * 4
                      + Mp * Np * out_bytes
                      + (Mp * Np * 2 if has_res else 0))
    cost = pl.CostEstimate(flops=2 * Mp * Kp * Np, transcendentals=0,
                           bytes_accessed=bytes_accessed)

    out = pl.pallas_call(
        functools.partial(_conv_mm_kernel, act=act, has_res=has_res),
        out_shape=jax.ShapeDtypeStruct((Mp, Np), out_dtype),
        grid_spec=pltpu.PrefetchScalarGridSpec(
            num_scalar_prefetch=0,
            grid=grid,
            in_specs=in_specs,
            out_specs=pl.BlockSpec((tm, tn), lambda i, j, k: (i, j)),
            scratch_shapes=[pltpu.VMEM((tm, tn), jnp.float32)],
        ),
        compiler_params=pltpu.CompilerParams(
            dimension_semantics=("parallel", "parallel", "arbitrary"),
            vmem_limit_bytes=VMEM_LIMIT),
        cost_estimate=cost,
    )(*inputs)

    if (Mp, Np) != (M, n_valid):
        out = out[:M, :n_valid]
    return out


# ----------------------------------------------------------------------------
# JAX glue: im2col, upsample, concat (pure data movement / reshapes)
# ----------------------------------------------------------------------------
def _im2col(x, ks, stride, pad):
    # x: (B, H, W, C) -> (B*Ho*Wo, ks*ks*C) with patch feature order (kh, kw, cin)
    B, H, W, C = x.shape
    if pad:
        x = jnp.pad(x, ((0, 0), (pad, pad), (pad, pad), (0, 0)))
    Ho = (H + 2 * pad - ks) // stride + 1
    Wo = (W + 2 * pad - ks) // stride + 1
    cols = []
    for i in range(ks):
        for j in range(ks):
            cols.append(x[:, i:i + stride * Ho:stride, j:j + stride * Wo:stride, :])
    patches = jnp.concatenate(cols, axis=-1)  # (B, Ho, Wo, ks*ks*C)
    return patches.reshape(B * Ho * Wo, ks * ks * C), Ho, Wo


def conv_block(x, p, act=True, residual=None, out_dtype=ACT_DTYPE):
    """Conv2d (no bias) + folded BN + LeakyReLU (+ fused residual add)."""
    ks, stride = p["ks"], p["stride"]
    B = x.shape[0]
    if ks == 1 and stride == 1:
        Ho, Wo = x.shape[1], x.shape[2]
        cols = x.reshape(B * Ho * Wo, x.shape[3])   # 1x1 conv: no im2col needed
    else:
        # TODO(synk): replace the HBM-materialized 3x3 im2col with in-kernel
        # shifted-window accumulation (extra (kh,kw) reduction grid axes) to remove
        # the 9x patch-matrix HBM round trip.
        cols, Ho, Wo = _im2col(x, ks, stride, (ks - 1) // 2)
    Cout = p["cout"]
    res2 = residual.reshape(B * Ho * Wo, Cout) if residual is not None else None
    out = matmul_bias_act(cols, p["wmat"], p["bias"], act=act,
                          n_valid=Cout, residual=res2, out_dtype=out_dtype)
    return out.reshape(B, Ho, Wo, Cout)


def upsample_nearest_2x(x):
    # nn.Upsample(scale_factor=2, mode='nearest') on NHWC
    x = jnp.repeat(x, 2, axis=1)
    x = jnp.repeat(x, 2, axis=2)
    return x


# ----------------------------------------------------------------------------
# Deterministic parameter construction (weights pre-padded, BN folded, bf16)
# ----------------------------------------------------------------------------
class ParamGen:
    def __init__(self, seed=0):
        self.key = jax.random.PRNGKey(seed)

    def next(self):
        self.key, k = jax.random.split(self.key)
        return k


def make_conv(pg, cin, cout, ks, stride=1, bn=True):
    fan_in = cin * ks * ks
    w = jax.random.normal(pg.next(), (ks, ks, cin, cout), jnp.float32) / jnp.sqrt(
        jnp.float32(fan_in))
    if bn:
        gamma = 1.0 + 0.1 * jax.random.normal(pg.next(), (cout,), jnp.float32)
        beta = 0.1 * jax.random.normal(pg.next(), (cout,), jnp.float32)
        mean = 0.1 * jax.random.normal(pg.next(), (cout,), jnp.float32)
        var = 1.0 + 0.1 * jnp.abs(jax.random.normal(pg.next(), (cout,), jnp.float32))
        scale = gamma / jnp.sqrt(var + BN_EPS)
        bias = beta - mean * scale
    else:
        scale = jnp.ones((cout,), jnp.float32)
        bias = jnp.zeros((cout,), jnp.float32)

    # Fold the BN scale into the weight columns; pad/reshape once, offline.
    w = w * scale[None, None, None, :]
    K, N = ks * ks * cin, cout
    Kp, Np = _round_up(K, 128), _round_up(N, 128)
    wmat = w.reshape(K, N)                       # (kh*kw*cin, cout) matches im2col order
    if (Kp, Np) != (K, N):
        wmat = jnp.pad(wmat, ((0, Kp - K), (0, Np - N)))
    bias_p = jnp.pad(bias, (0, Np - N)).reshape(1, Np)
    return {"wmat": wmat.astype(jnp.bfloat16), "bias": bias_p,
            "ks": ks, "stride": stride, "cout": cout}


def make_darknet_params(pg, layers=(1, 2, 8, 8, 4)):
    params = {"stem": make_conv(pg, 3, 32, 3), "layers": []}
    inplanes = 32
    plane_list = [(32, 64), (64, 128), (128, 256), (256, 512), (512, 1024)]
    for n, (p0, p1) in zip(layers, plane_list):
        layer = {"down": make_conv(pg, inplanes, p1, 3, stride=2), "blocks": []}
        for _ in range(n):
            layer["blocks"].append((make_conv(pg, p1, p0, 1),
                                    make_conv(pg, p0, p1, 3)))
        inplanes = p1
        params["layers"].append(layer)
    return params


def make_cob_params(pg, in_channel, channel_list):
    c0, c1 = channel_list
    plan = [(in_channel, c0, 1), (c0, c1, 3), (c1, c0, 1),
            (c0, c1, 3), (c1, c0, 1), (c0, c1, 3)]
    return [make_conv(pg, ci, co, ks) for ci, co, ks in plan]


def make_model_params(seed=0):
    pg = ParamGen(seed)
    class_num, bbox_num, loc_conf_num = 12, 3, 5
    out_channels = bbox_num * (loc_conf_num + class_num)  # 51
    params = {
        "darknet": make_darknet_params(pg),
        "head13": make_conv(pg, 1024, out_channels, 1, bn=False),  # conv_11_0
        "head26": make_conv(pg, 512, out_channels, 1, bn=False),   # conv_11_1
        "head52": make_conv(pg, 256, out_channels, 1, bn=False),   # conv_11_2
        "con_1": make_conv(pg, 1024, 256, 1, bn=False),
        "con_2": make_conv(pg, 512, 128, 1, bn=False),
        "embedding13": make_cob_params(pg, 1024, [512, 1024]),
        "embedding26": make_cob_params(pg, 768, [256, 512]),
        "embedding52": make_cob_params(pg, 384, [128, 256]),
    }
    return params


# ----------------------------------------------------------------------------
# Forward passes
# ----------------------------------------------------------------------------
def darknet_forward(x, params):
    x = conv_block(x, params["stem"])
    outs = []
    for layer in params["layers"]:
        x = conv_block(x, layer["down"])
        for c1, c2 in layer["blocks"]:
            r = x
            h = conv_block(x, c1)
            x = conv_block(h, c2, residual=r)   # residual add fused into the kernel
        outs.append(x)
    # out52 (C=256, /8), out26 (C=512, /16), out13 (C=1024, /32)
    return outs[2], outs[3], outs[4]


def cob_forward(x, params):
    for p in params:
        x = conv_block(x, p)
    return x


def model_main_forward(x_nchw, params):
    x = jnp.transpose(x_nchw, (0, 2, 3, 1)).astype(ACT_DTYPE)  # NCHW -> NHWC, bf16

    out52, out26, out13 = darknet_forward(x, params["darknet"])

    x_13 = cob_forward(out13, params["embedding13"])
    branch_1 = upsample_nearest_2x(x_13)
    branch_1 = conv_block(branch_1, params["con_1"], act=False)      # plain 1x1 conv
    com_1 = jnp.concatenate([out26, branch_1], axis=-1)
    x_13_out = conv_block(x_13, params["head13"], act=False,
                          out_dtype=jnp.float32)                     # conv_11_0

    x_26 = cob_forward(com_1, params["embedding26"])
    branch_2 = upsample_nearest_2x(x_26)
    branch_2 = conv_block(branch_2, params["con_2"], act=False)      # plain 1x1 conv
    com_2 = jnp.concatenate([out52, branch_2], axis=-1)
    x_26_out = conv_block(x_26, params["head26"], act=False,
                          out_dtype=jnp.float32)                     # conv_11_1

    x_52 = cob_forward(com_2, params["embedding52"])
    x_52_out = conv_block(x_52, params["head52"], act=False,
                          out_dtype=jnp.float32)                     # conv_11_2

    to_nchw = lambda t: jnp.transpose(t, (0, 3, 1, 2))
    return to_nchw(x_13_out), to_nchw(x_26_out), to_nchw(x_52_out)


if __name__ == "__main__":
    key = jax.random.PRNGKey(0)
    # small NCHW input (must be divisible by 32 for the 5 darknet strides)
    x = jax.random.normal(key, (2, 3, 64, 64), jnp.float32)
    params = make_model_params(seed=0)

    x_13, x_26, x_52 = model_main_forward(x, params)
    jax.block_until_ready((x_13, x_26, x_52))

    assert x_13.shape == (2, 51, 2, 2), x_13.shape
    assert x_26.shape == (2, 51, 4, 4), x_26.shape
    assert x_52.shape == (2, 51, 8, 8), x_52.shape
    assert jnp.all(jnp.isfinite(x_13)) and jnp.all(jnp.isfinite(x_26)) and jnp.all(jnp.isfinite(x_52))

    print("KERNEL_OK")
</pallas_src>

<mosaic_0001>
module attributes {stable_mosaic.version = 11 : i64} {
  func.func @_conv_mm_kernel(%arg0: i32, %arg1: i32, %arg2: i32, %arg3: memref<512x128xbf16, #tpu.memory_space<vmem>>, %arg4: memref<128x128xbf16, #tpu.memory_space<vmem>>, %arg5: memref<1x128xf32, #tpu.memory_space<vmem>>, %arg6: memref<512x128xbf16, #tpu.memory_space<vmem>>, %arg7: memref<512x128xf32, #tpu.memory_space<vmem>>) attributes {dimension_semantics = [#tpu.dimension_semantics<parallel>, #tpu.dimension_semantics<parallel>, #tpu.dimension_semantics<arbitrary>], iteration_bounds = array<i64: 16, 1, 1>, scalar_prefetch = 0 : i64, scratch_operands = 1 : i64, tpu.core_type = #tpu.core_type<tc>, window_params = [{transform_indices = @transform_0, window_bounds = array<i64: 512, 128>}, {transform_indices = @transform_1, window_bounds = array<i64: 128, 128>}, {transform_indices = @transform_2, window_bounds = array<i64: 1, 128>}, {transform_indices = @transform_3, window_bounds = array<i64: 512, 128>}]} {
    %c0_i32 = arith.constant 0 : i32
    %0 = arith.cmpi eq, %arg2, %c0_i32 : i32
    %1 = arith.extui %0 : i1 to i32
    %c0_i32_0 = arith.constant 0 : i32
    %2 = arith.cmpi ne, %1, %c0_i32_0 : i32
    scf.if %2 {
      %cst_10 = arith.constant 0.000000e+00 : f32
      %12 = vector.broadcast %cst_10 : f32 to vector<512x128xf32>
      %c0_11 = arith.constant 0 : index
      %c0_12 = arith.constant 0 : index
      %13 = vector.load %arg7[%c0_11, %c0_12] : memref<512x128xf32, #tpu.memory_space<vmem>>, vector<512x128xf32>
      tpu.vector_store %arg7[%c0_11, %c0_12], %12 {strides = array<i32>} : memref<512x128xf32, #tpu.memory_space<vmem>>, vector<512x128xf32>,
    } else {
    }
    %c0 = arith.constant 0 : index
    %c0_1 = arith.constant 0 : index
    %3 = vector.load %arg7[%c0, %c0_1] : memref<512x128xf32, #tpu.memory_space<vmem>>, vector<512x128xf32>
    %c0_2 = arith.constant 0 : index
    %c0_3 = arith.constant 0 : index
    %4 = vector.load %arg3[%c0_2, %c0_3] : memref<512x128xbf16, #tpu.memory_space<vmem>>, vector<512x128xbf16>
    %c0_4 = arith.constant 0 : index
    %c0_5 = arith.constant 0 : index
    %5 = vector.load %arg4[%c0_4, %c0_5] : memref<128x128xbf16, #tpu.memory_space<vmem>>, vector<128x128xbf16>
    %cst = arith.constant dense<0.000000e+00> : vector<512x128xf32>
    %6 = tpu.matmul %4, %5, %cst {dimension_numbers = #tpu.dot_dimension_numbers<[1], [0], [0], [1], [0, 0, 1, 1], [], []>} : vector<512x128xbf16>, vector<128x128xbf16>, vector<512x128xf32> -> vector<512x128xf32>
    %7 = arith.addf %3, %6 : vector<512x128xf32>
    %c0_6 = arith.constant 0 : index
    %c0_7 = arith.constant 0 : index
    %8 = vector.load %arg7[%c0_6, %c0_7] : memref<512x128xf32, #tpu.memory_space<vmem>>, vector<512x128xf32>
    tpu.vector_store %arg7[%c0_6, %c0_7], %7 {strides = array<i32>} : memref<512x128xf32, #tpu.memory_space<vmem>>, vector<512x128xf32>,
    %c0_i32_8 = arith.constant 0 : i32
    %9 = arith.cmpi eq, %arg2, %c0_i32_8 : i32
    %10 = arith.extui %9 : i1 to i32
    %c0_i32_9 = arith.constant 0 : i32
    %11 = arith.cmpi ne, %10, %c0_i32_9 : i32
    scf.if %11 {
      %c0_10 = arith.constant 0 : index
      %c0_11 = arith.constant 0 : index
      %12 = vector.load %arg7[%c0_10, %c0_11] : memref<512x128xf32, #tpu.memory_space<vmem>>, vector<512x128xf32>
      %c0_12 = arith.constant 0 : index
      %c0_13 = arith.constant 0 : index
      %13 = vector.load %arg5[%c0_12, %c0_13] : memref<1x128xf32, #tpu.memory_space<vmem>>, vector<1x128xf32>
      %14 = vector.broadcast %13 : vector<1x128xf32> to vector<512x128xf32>
      %15 = arith.addf %12, %14 : vector<512x128xf32>
      %cst_14 = arith.constant 0.000000e+00 : f32
      %16 = vector.broadcast %cst_14 : f32 to vector<512x128xf32>
      %17 = arith.cmpf ogt, %15, %16 : vector<512x128xf32>
      %cst_15 = arith.constant 1.000000e-01 : f32
      %18 = vector.broadcast %cst_15 : f32 to vector<512x128xf32>
      %19 = arith.mulf %18, %15 : vector<512x128xf32>
      %20 = arith.select %17, %15, %19 : vector<512x128xi1>, vector<512x128xf32>
      %21 = arith.truncf %20 : vector<512x128xf32> to vector<512x128xbf16>
      %c0_16 = arith.constant 0 : index
      %c0_17 = arith.constant 0 : index
      %22 = vector.load %arg6[%c0_16, %c0_17] : memref<512x128xbf16, #tpu.memory_space<vmem>>, vector<512x128xbf16>
      tpu.vector_store %arg6[%c0_16, %c0_17], %21 {strides = array<i32>} : memref<512x128xbf16, #tpu.memory_space<vmem>>, vector<512x128xbf16>,
    } else {
    }
    return
  }
  func.func @transform_0(%arg0: i32, %arg1: i32, %arg2: i32) -> (i32, i32) {
    %c0_i32 = arith.constant 0 : i32
    return %arg0, %arg2 : i32, i32
  }
  func.func @transform_1(%arg0: i32, %arg1: i32, %arg2: i32) -> (i32, i32) {
    %c0_i32 = arith.constant 0 : i32
    return %arg2, %arg1 : i32, i32
  }
  func.func @transform_2(%arg0: i32, %arg1: i32, %arg2: i32) -> (i32, i32) {
    %c0_i32 = arith.constant 0 : i32
    %c0_i32_0 = arith.constant 0 : i32
    return %c0_i32, %arg1 : i32, i32
  }
  func.func @transform_3(%arg0: i32, %arg1: i32, %arg2: i32) -> (i32, i32) {
    %c0_i32 = arith.constant 0 : i32
    return %arg0, %arg1 : i32, i32
  }
}

</mosaic_0001>

<bundles_post_ra>
// kernel: tpu_custom_call.1
= control target key start
LH: loop header
LB: loop body
LE: loop exit
PB: predicated region body
PF: predicated region fallthrough
CT: control target
= control target key end

     0   :  { %8 = vsyncpa [#allocation4], 0  ;;  %s3157_s0 = inlined_call_operand.hbm [shape: bf16[8192,128], index: 0, kind: input, shape index: {}]   ;;  %s3158_s1 = inlined_call_operand.hbm [shape: bf16[128,128], index: 1, kind: input, shape index: {}]   ;;  %s3159_s2 = inlined_call_operand.hbm [shape: f32[1,128], index: 2, kind: input, shape index: {}]   ;;  %s3160_s3 = inlined_call_operand.hbm [shape: bf16[8192,128], index: 3, kind: output, shape index: {}]  }
   0x1   :  { %10 = vsyncpa [#allocation4 + $0x1], 0 }
   0x2   :  { %11 = vsyncpa [#allocation7], 0 }
   0x3   :  { %12 = vsyncpa [#allocation5], 0 }
   0x4   :  { %14 = vsyncpa [#allocation5 + $0x1], 0  ;;  %s2755_s12 = smov 0   ;;  %s2757_s13 = smov 0  }
   0x5   :  { %s2759_s14 = smov 0   ;;  %s2761_s15 = smov 0  }
   0x6   :  { %s2763_s16 = smov 0   ;;  %s2765_s17 = smov 0  }
   0x7 LB: > { %s1909_s18 = sadd.s32 4294967295, %s2725_s17   ;;  %s1910_s19 = sadd.s32 4294967294, %s2725_s17   ;;  %s2725_s17 = sphi %s2765_s17, %s20_s17   ;;  %s2721_s16 = sphi %s2763_s16, %s3182_s16   ;;  %s2717_s15 = sphi %s2761_s15, %s3181_s15   ;;  %s2713_s14 = sphi %s2759_s14, %s3180_s14   ;;  %s2709_s13 = sphi %s2757_s13, %s3179_s13   ;;  %s2705_s12 = sphi %s2755_s12, %s3178_s12  }
   0x8   : > { %p61_p0 = scmp.ne.s32.totalorder %s2709_s13, %s2705_s12  ;;  %p2789_p1 = scmp.eq.s32.totalorder %s1909_s18, 0 }
   0x9   : > { %p2793_p2 = scmp.eq.s32.totalorder %s1909_s18, 15  ;;  %p147_p3 = scmp.eq.s32.totalorder %s1910_s19, 15 }
   0xa   : > { %s3165_s20 = scalar_select %p2789_p1, 1, 0 }
   0xb   : > { %s3166_s21 = scalar_select %p2793_p2, 1, 0 }
   0xc   : > { %p2799_p4 = por %p2789_p1, %p61_p0  ;;  %p1911_p5 = scmp.ge.s32.totalorder %s2725_s17, 1 }
   0xd   : > { %p2804_p6 = por %p147_p3, %p61_p0  ;;  %p154_p7 = scmp.lt.s32.totalorder %s2725_s17, 17 }
   0xe   : > { %s3167_s22 = scalar_select %p2799_p4, 1, 0 }
   0xf   : > { %s3168_s23 = scalar_select %p2804_p6, 1, 0 }
  0x10   : > { %p2809_p8 = pnand %p1911_p5, %p154_p7  ;;  %s2727_s25 = smov [#allocation6]  }
  0x11   : > { %s170_s26 = sshll.u32 %s2727_s25, 4  ;;  %s2728_s28 = smov [#allocation8]   ;;  %s171_s26 = int_to_ptr.vmem [resolvable:$true] %s170_s26 }
  0x12   : > { %s3169_s24 = scalar_select %p2809_p8, 1, 0 }
  0x13   : > { %p2438_p9 = pneg %p2809_p8  ;;  %s186_s29 = sshll.u32 %s2728_s28, 4  ;;  %s2821_s29 = int_to_ptr.vmem [resolvable:$true] %s186_s29 }
  0x14   : > { %s2553_s5 = scalar_lea.hbm %s3158_s1, 1024 }
  0x15   : > { %p2817_p10 = pnand %p2438_p9, %p2789_p1  ;;  %p2554_p11 = scmp.ne.s32.totalorder %s3158_s1, %s2553_s5 }
  0x16   : > { %p2560_p3 = scmp.lt.u32.totalorder %s2553_s5, %s3158_s1 }
  0x17   : > { %p2555_p12 = pneg %p2817_p10 }
  0x19   : > { %p2556_p13 = pnand %p2555_p12, %p2554_p11 }
  0x1b   : > { %p2557_p0 = pneg %p2556_p13 }
  0x1d   : > { %p2562_p5 = pnand %p2560_p3, %p2557_p0 }
  0x1f   : > { %2565 = shalt.err (!%p2562_p5)
}
  0x20   : > { %s2566_s10 = scalar_lea.vmem %s171_s26, 1024  ;;  %p2574_p1 = scmp.lt.s32.totalorder %s171_s26, %s171_s26 }
  0x21   : > { %p2567_p7 = scmp.ne.s32.totalorder %s171_s26, %s2566_s10  ;;  %p2575_p4 = scmp.lt.s32.totalorder %s2566_s10, %s2566_s10 }
  0x23   : > { %p2569_p9 = pnand %p2567_p7, %p2555_p12  ;;  %p2576_p8 = por %p2575_p4, %p2574_p1 }
  0x25   : > { %p2570_p6 = pneg %p2569_p9 }
  0x27   : > { %p2577_p2 = pnand %p2576_p8, %p2570_p6 }
  0x29   : > { %2580 = shalt.err (!%p2577_p2)
}
  0x2a   : > { %s2729_s11 = smov 64   ;;  %s2730_s18 = smov 4  }
  0x2b   : > { %2441 = dma.hbm_to_vmem [thread:$0]  (!%p2817_p10), %s3158_s1, 1024, %s171_s26, [#allocation7], %s2729_s11, %s2729_s11, %s2730_s18  }
  0x2c   : > { %s2581_s4 = scalar_lea.hbm %s3159_s2, 16 }
  0x2d   : > { %p2582_p1 = scmp.ne.s32.totalorder %s3159_s2, %s2581_s4  ;;  %p2588_p6 = scmp.lt.u32.totalorder %s2581_s4, %s3159_s2 }
  0x2f   : > { %p2584_p2 = pnand %p2582_p1, %p2555_p12 }
  0x31   : > { %p2585_p4 = pneg %p2584_p2 }
  0x33   : > { %p2590_p8 = pnand %p2588_p6, %p2585_p4 }
  0x35   : > { %2593 = shalt.err (!%p2590_p8)
}
  0x36   : > { %s2594_s26 = scalar_lea.vmem %s2821_s29, 16  ;;  %s2601_s9 = scalar_lea.vmem %s2821_s29, 32 }
  0x37   : > { %p2595_p11 = scmp.ne.s32.totalorder %s2821_s29, %s2594_s26  ;;  %p2602_p3 = scmp.lt.s32.totalorder %s2821_s29, %s2821_s29 }
  0x38   : > { %p2603_p5 = scmp.lt.s32.totalorder %s2601_s9, %s2594_s26 }
  0x39   : > { %p2597_p13 = pnand %p2595_p11, %p2555_p12 }
  0x3a   : > { %p2604_p7 = por %p2603_p5, %p2602_p3 }
  0x3b   : > { %p2598_p0 = pneg %p2597_p13 }
  0x3d   : > { %p2605_p9 = pnand %p2604_p7, %p2598_p0 }
  0x3f   : > { %2608 = shalt.err (!%p2605_p9)
}
  0x40   : > { %2444 = dma.hbm_to_vmem [thread:$0]  (!%p2817_p10), %s3159_s2, 16, %s2821_s29, [#allocation7]  }
  0x41   : > { %s39_s25 = sadd.s32 1, %s2721_s16  ;;  %s48_s28 = sadd.s32 1, %s2713_s14 }
  0x42   : > { %p41_p12 = scmp.ge.s32.totalorder %s39_s25, 16  ;;  %p55_p1 = scmp.ne.s32.totalorder %s2713_s14, %s2709_s13 }
  0x43   : > { %p56_p2 = scmp.eq.s32.totalorder %s2725_s17, 0  ;;  %p2455_p4 = scmp.lt.s32.totalorder %s2725_s17, 16 }
  0x44   : > { %s3184_s25 = smov (%p41_p12, %s39_s25), 0  ;;  %p3171_p8 = scmp.ne.s32.totalorder %s3166_s21, 0 }
  0x45   : > { %p57_p6 = por %p56_p2, %p55_p1  ;;  %s43_s30 = ssub.s32 %s2721_s16, %s3184_s25 }
  0x46   : > { %p2884_p11 = por %p3171_p8, %p55_p1  ;;  %s197_s4 = sand.u32 1, %s2713_s14  }
  0x47   : > { %p46_p13 = scmp.eq.s32.totalorder %s43_s30, 0  ;;  %s1915_s29 = sshll.u32 %s197_s4, 8 }
  0x48   : > { %s2033_s5 = sshll.u32 %s2721_s16, 12  ;;  %s201_s21 = scalar_lea.vmem [#allocation3], %s1915_s29 }
  0x49   : > { %s2893_s6 = scalar_select %p46_p13, %s2713_s14, %s48_s28  }
  0x4a   : > { %s2898_s26 = scalar_lea.hbm %s3157_s0, %s2033_s5  ;;  %s209_s9 = sshll.u32 %s201_s21, 4  ;;  %s2906_s9 = int_to_ptr.vmem [resolvable:$true] %s209_s9 }
  0x4b   : > { %p2902_p10 = pnand %p2455_p4, %p57_p6  ;;  %s2908_s19 = scalar_lea.sflag [#allocation4], %s197_s4 }
  0x4c   : > { %s2609_s28 = scalar_lea.hbm %s2898_s26, 4096  ;;  %s2614_s5 = scalar_lea.hbm %s3157_s0, 65536 }
  0x4d   : > { %p2610_p0 = scmp.ne.s32.totalorder %s2898_s26, %s2609_s28  ;;  %p2611_p3 = pneg %p2902_p10 }
  0x4e   : > { %p2615_p9 = scmp.lt.u32.totalorder %s2898_s26, %s3157_s0  ;;  %p2616_p12 = scmp.lt.u32.totalorder %s2614_s5, %s2609_s28 }
  0x4f   : > { %p2612_p5 = pnand %p2611_p3, %p2610_p0  ;;  %p2618_p2 = scmp.lt.u32.totalorder %s2609_s28, %s2898_s26 }
  0x50   : > { %p2617_p1 = por %p2616_p12, %p2615_p9 }
  0x51   : > { %p2613_p7 = pneg %p2612_p5 }
  0x52   : > { %p2619_p4 = por %p2618_p2, %p2617_p1 }
  0x54   : > { %p2620_p6 = pnand %p2619_p4, %p2613_p7 }
  0x56   : > { %2623 = shalt.err (!%p2620_p6)
}
  0x57   : > { %s2624_s4 = scalar_lea.vmem %s2906_s9, 4096  ;;  %s2731_s21 = smov [#allocation3]  }
  0x58   : > { %p2625_p8 = scmp.ne.s32.totalorder %s2906_s9, %s2624_s4  ;;  %s2629_s30 = sshll.u32 %s2731_s21, 4  ;;  %s2630_s30 = int_to_ptr.vmem [resolvable:$false] %s2629_s30 }
  0x59   : > { %s2631_s29 = scalar_lea.vmem %s2630_s30, 8192  ;;  %p2632_p5 = scmp.lt.s32.totalorder %s2906_s9, %s2630_s30 }
  0x5a   : > { %p2627_p13 = pnand %p2625_p8, %p2611_p3  ;;  %p2633_p9 = scmp.lt.s32.totalorder %s2631_s29, %s2624_s4 }
  0x5c   : > { %p2628_p0 = pneg %p2627_p13  ;;  %p2634_p12 = por %p2633_p9, %p2632_p5 }
  0x5e   : > { %p2635_p1 = pnand %p2634_p12, %p2628_p0 }
  0x60   : > { %2638 = shalt.err (!%p2635_p1)
}
  0x61   : > { %2448 = dma.hbm_to_vmem [thread:$0]  (!%p2902_p10), %s2898_s26, 4096, %s2906_s9, %s2908_s19, %s2729_s11, %s2729_s11, %s2730_s18  }
  0x62   : > { %p3174_p3 = scmp.ne.s32.totalorder %s3169_s24, 0 }
  0x63   : > { %s2942_s28 = sand.u32 (!%p3174_p3), 1, %s2709_s13   ;;  %p3175_p7 = scmp.ne.s32.totalorder (!%p3174_p3), %s3167_s22, 0 }
  0x64   : > { %221 = sbr.rel (%p3174_p3) target bundleno = 447 (0x1bf), region = 32  ;;  %s1919_s5 = sshll.u32 (!%p3174_p3), %s2942_s28, 8 }
  0x65   : > { %s224_s7 = scalar_lea.sflag (!%p3174_p3), [#allocation4], %s2942_s28  ;;  %s2948_s10 = scalar_lea.vmem (!%p3174_p3), [#allocation3], %s1919_s5 }
  0x6b   : > { %2692 = dma.done.wait (%p3175_p7), %s224_s7, 4096  }
  0x6c   : > { %2694 = vsyncadd (%p3175_p7), %s224_s7, 4294963200  ;;  %p3176_p10 = scmp.ne.s32.totalorder %s3165_s20, 0 }
  0x6e   : > { %2696 = dma.done.wait (%p3176_p10), [#allocation7], 1040  }
  0x6f   : > { %2698 = vsyncadd (%p3176_p10), [#allocation7], 4294966256  ;;  %v2513_v0 = vld [vmem:[#allocation6] sm:$0xff]   ;;  %v2514_v1 = vld [vmem:[#allocation6 + $0x8] sm:$0xff]   ;;  %s3006_s20 = scalar_lea.vmem [#allocation9], %s1919_s5  ;;  %s2098_s22 = sshll.u32 %s2717_s15, 12 }
  0x70   : > { %2330 = vmatprep.subr.bf16.mxu0 %v2513_v0  ;;  %2410 = vmatprep.subr.bf16.mxu1 %v2513_v0  ;;  %v2515_v2 = vld [vmem:[#allocation6 + $0x10] sm:$0xff]   ;;  %v2516_v3 = vld [vmem:[#allocation6 + $0x18] sm:$0xff]   ;;  %v2521_v4 = vld [vmem:[%s2948_s10] sm:$0xff]   ;;  %s1796_s24 = sshll.u32 %s3006_s20, 4  ;;  %s3103_s18 = scalar_lea.hbm %s3160_s3, %s2098_s22  ;;  %s3105_s24 = int_to_ptr.vmem [resolvable:$true] %s1796_s24 }
  0x71   : > { %2331 = vmatpush3.bf16.msra.mxu0 %v2513_v0  ;;  %2418 = vmatpush3.bf16.msra.mxu1 %v2513_v0  ;;  %v2522_v5 = vld [vmem:[%s2948_s10 + $0x80] sm:$0xff]   ;;  %v2518_v7 = vld [vmem:[#allocation6 + $0x28] sm:$0xff]   ;;  %v2519_v8 = vld [vmem:[#allocation6 + $0x30] sm:$0xff]   ;;  %s1782_s26 = scalar_lea.sflag [#allocation5], %s2942_s28  ;;  %s2639_s9 = scalar_lea.vmem %s3105_s24, 4096 }
  0x72   : > { %2332 = vmatprep.subr.bf16.mxu0 %v2514_v1  ;;  %2411 = vmatprep.subr.bf16.mxu1 %v2514_v1  ;;  %v2517_v6 = vld [vmem:[#allocation6 + $0x20] sm:$0xff]   ;;  %v2520_v9 = vld [vmem:[#allocation6 + $0x38] sm:$0xff]   ;;  %v2523_v10 = vld [vmem:[%s2948_s10 + $0x8] sm:$0xff]   ;;  %p2640_p2 = scmp.ne.s32.totalorder %s3105_s24, %s2639_s9  ;;  %s2732_s19 = smov [#allocation9]  }
  0x73   : > { %2346 = vmatprep.mubr.bf16.mxu0 %v2521_v4  ;;  %2378 = vmatprep.mubr.bf16.mxu1 %v2522_v5  ;;  %v2524_v11 = vld [vmem:[%s2948_s10 + $0x88] sm:$0xff]   ;;  %v2525_v12 = vld [vmem:[%s2948_s10 + $0x10] sm:$0xff]   ;;  %v2527_v14 = vld [vmem:[%s2948_s10 + $0x18] sm:$0xff]   ;;  %s2643_s8 = sshll.u32 %s2732_s19, 4  ;;  %s2644_s8 = int_to_ptr.vmem [resolvable:$false] %s2643_s8 }
  0x74   : > { %v2526_v13 = vld [vmem:[%s2948_s10 + $0x90] sm:$0xff]   ;;  %v2528_v15 = vld [vmem:[%s2948_s10 + $0x98] sm:$0xff]   ;;  %v2529_v16 = vld [vmem:[%s2948_s10 + $0x20] sm:$0xff]   ;;  %p2641_p4 = pnand %p2640_p2, %p2884_p11  ;;  %s2645_s4 = scalar_lea.vmem %s2644_s8, 8192 }
  0x75   : > { %2333 = vmatpush3.bf16.msra.mxu0 %v2514_v1  ;;  %2419 = vmatpush3.bf16.msra.mxu1 %v2514_v1  ;;  %v2530_v17 = vld [vmem:[%s2948_s10 + $0xa0] sm:$0xff]   ;;  %v2531_v18 = vld [vmem:[%s2948_s10 + $0x28] sm:$0xff]   ;;  %v2533_v20 = vld [vmem:[%s2948_s10 + $0x30] sm:$0xff]   ;;  %p2646_p8 = scmp.lt.s32.totalorder %s3105_s24, %s2644_s8  ;;  %p2647_p13 = scmp.lt.s32.totalorder %s2645_s4, %s2639_s9 }
  0x76   : > { %2334 = vmatprep.subr.bf16.mxu0 %v2515_v2  ;;  %2412 = vmatprep.subr.bf16.mxu1 %v2515_v2  ;;  %v2532_v19 = vld [vmem:[%s2948_s10 + $0xa8] sm:$0xff]   ;;  %v2534_v21 = vld [vmem:[%s2948_s10 + $0xb0] sm:$0xff]   ;;  %v2535_v22 = vld [vmem:[%s2948_s10 + $0x38] sm:$0xff]   ;;  %p2642_p6 = pneg %p2641_p4 }
  0x77   : > { %v2536_v23 = vld [vmem:[%s2948_s10 + $0xb8] sm:$0xff]   ;;  %v2537_v24 = vld [vmem:[%s2948_s10 + $0x40] sm:$0xff]   ;;  %v2539_v26 = vld [vmem:[%s2948_s10 + $0x48] sm:$0xff]   ;;  %p2648_p0 = por %p2647_p13, %p2646_p8 }
  0x78   : > { %v2538_v25 = vld [vmem:[%s2948_s10 + $0xc0] sm:$0xff]   ;;  %v2540_v27 = vld [vmem:[%s2948_s10 + $0xc8] sm:$0xff]   ;;  %v2541_v28 = vld [vmem:[%s2948_s10 + $0x50] sm:$0xff]  }
  0x79   : > { %2335 = vmatpush3.bf16.msra.mxu0 %v2515_v2  ;;  %2420 = vmatpush3.bf16.msra.mxu1 %v2515_v2  ;;  %v2542_v29 = vld [vmem:[%s2948_s10 + $0xd0] sm:$0xff]   ;;  %v2543_v30 = vld [vmem:[%s2948_s10 + $0x58] sm:$0xff]   ;;  %v2545_v32 = vld [vmem:[%s2948_s10 + $0x60] sm:$0xff]   ;;  %p2649_p5 = pnand %p2648_p0, %p2642_p6 }
  0x7a   : > { %2336 = vmatprep.subr.bf16.mxu0 %v2516_v3  ;;  %2413 = vmatprep.subr.bf16.mxu1 %v2516_v3  ;;  %v2544_v31 = vld [vmem:[%s2948_s10 + $0xd8] sm:$0xff]   ;;  %v2546_v33 = vld [vmem:[%s2948_s10 + $0xe0] sm:$0xff]   ;;  %v2547_v34 = vld [vmem:[%s2948_s10 + $0x68] sm:$0xff]  }
  0x7b   : > { %v2548_v35 = vld [vmem:[%s2948_s10 + $0xe8] sm:$0xff]   ;;  %v2549_v36 = vld [vmem:[%s2948_s10 + $0x70] sm:$0xff]   ;;  %v2551_v38 = vld [vmem:[%s2948_s10 + $0x78] sm:$0xff]  }
  0x7c   : > { %v2550_v37 = vld [vmem:[%s2948_s10 + $0xf0] sm:$0xff]   ;;  %v2552_v39 = vld [vmem:[%s2948_s10 + $0xf8] sm:$0xff]   ;;  %v2990_v40 = vld [vmem:[#allocation8] ss:$0 sm:$0xff] }
  0x7d   : > { %2337 = vmatpush3.bf16.msra.mxu0 %v2516_v3  ;;  %2421 = vmatpush3.bf16.msra.mxu1 %v2516_v3 }
  0x7e   : > { %2338 = vmatprep.subr.bf16.mxu0 %v2517_v6  ;;  %2414 = vmatprep.subr.bf16.mxu1 %v2517_v6 }
  0x81   : > { %2339 = vmatpush3.bf16.msra.mxu0 %v2517_v6  ;;  %2422 = vmatpush3.bf16.msra.mxu1 %v2517_v6 }
  0x82   : > { %2340 = vmatprep.subr.bf16.mxu0 %v2518_v7  ;;  %2415 = vmatprep.subr.bf16.mxu1 %v2518_v7 }
  0x85   : > { %2341 = vmatpush3.bf16.msra.mxu0 %v2518_v7  ;;  %2423 = vmatpush3.bf16.msra.mxu1 %v2518_v7 }
  0x86   : > { %2342 = vmatprep.subr.bf16.mxu0 %v2519_v8  ;;  %2416 = vmatprep.subr.bf16.mxu1 %v2519_v8 }
  0x89   : > { %2343 = vmatpush3.bf16.msra.mxu0 %v2519_v8  ;;  %2424 = vmatpush3.bf16.msra.mxu1 %v2519_v8 }
  0x8a   : > { %2344 = vmatprep.subr.bf16.mxu0 %v2520_v9  ;;  %2417 = vmatprep.subr.bf16.mxu1 %v2520_v9 }
  0x8d   : > { %2345 = vmatpush3.bf16.msra.mxu0 %v2520_v9  ;;  %2425 = vmatpush3.bf16.msra.mxu1 %v2520_v9 }
  0x90   : > { %2347 = vmatmul.mubr.bf16.vlgmr.msra.gmra.mrb[0].mxu0 %v2523_v10  ;;  %2379 = vmatmul.mubr.bf16.vlgmr.msra.gmra.mrb[0].mxu1 %v2524_v11 }
  0x91   : > { %2350 = vmatprep.mubr.bf16.mxu0 %v2525_v12  ;;  %2382 = vmatprep.mubr.bf16.mxu1 %v2526_v13 }
  0x98   : > { %2351 = vmatmul.mubr.bf16.gmra.mrb[4].mxu0 %v2527_v14  ;;  %2383 = vmatmul.mubr.bf16.gmra.mrb[4].mxu1 %v2528_v15 }
  0x99   : > { %2354 = vmatprep.mubr.bf16.mxu0 %v2529_v16  ;;  %2386 = vmatprep.mubr.bf16.mxu1 %v2530_v17 }
  0xa0   : > { %2355 = vmatmul.mubr.bf16.gmra.mrb[8].mxu0 %v2531_v18  ;;  %2387 = vmatmul.mubr.bf16.gmra.mrb[8].mxu1 %v2532_v19 }
  0xa1   : > { %2358 = vmatprep.mubr.bf16.mxu0 %v2533_v20  ;;  %2390 = vmatprep.mubr.bf16.mxu1 %v2534_v21 }
  0xa8   : > { %2359 = vmatmul.mubr.bf16.gmra.mrb[12].mxu0 %v2535_v22  ;;  %2391 = vmatmul.mubr.bf16.gmra.mrb[12].mxu1 %v2536_v23 }
  0xa9   : > { %2362 = vmatprep.mubr.bf16.mxu0 %v2537_v24  ;;  %2394 = vmatprep.mubr.bf16.mxu1 %v2538_v25 }
  0xb0   : > { %2363 = vmatmul.mubr.bf16.gmra.mrb[16].mxu0 %v2539_v26  ;;  %2395 = vmatmul.mubr.bf16.gmra.mrb[16].mxu1 %v2540_v27 }
  0xb1   : > { %2366 = vmatprep.mubr.bf16.mxu0 %v2541_v28  ;;  %2398 = vmatprep.mubr.bf16.mxu1 %v2542_v29 }
  0xb8   : > { %2367 = vmatmul.mubr.bf16.gmra.mrb[20].mxu0 %v2543_v30  ;;  %2399 = vmatmul.mubr.bf16.gmra.mrb[20].mxu1 %v2544_v31 }
  0xb9   : > { %2370 = vmatprep.mubr.bf16.mxu0 %v2545_v32  ;;  %2402 = vmatprep.mubr.bf16.mxu1 %v2546_v33 }
  0xc0   : > { %2371 = vmatmul.mubr.bf16.gmra.mrb[24].mxu0 %v2547_v34  ;;  %2403 = vmatmul.mubr.bf16.gmra.mrb[24].mxu1 %v2548_v35 }
  0xc1   : > { %2374 = vmatprep.mubr.bf16.mxu0 %v2549_v36  ;;  %2406 = vmatprep.mubr.bf16.mxu1 %v2550_v37 }
  0xc8   : > { %2375 = vmatmul.mubr.bf16.gmra.mrb[28].mxu0 %v2551_v38  ;;  %2407 = vmatmul.mubr.bf16.gmra.mrb[28].mxu1 %v2552_v39 }
 0x163   : > { %v2348_v41 = vpop.f32.mrb[0].mxu0  ;;  %v2380_v42 = vpop.f32.mrb[0].mxu1 }
 0x164   : > { %v1207_v43 = vadd.f32 %v2348_v41, %v2990_v40  ;;  %v1239_v44 = vadd.f32 %v2380_v42, %v2990_v40  ;;  %v748_v45 = vpop.f32.mrb[1].mxu0  ;;  %v876_v46 = vpop.f32.mrb[1].mxu1 }
 0x165   : > { %v1205_v47 = vadd.f32 %v2990_v40, %v748_v45  ;;  %v1237_v48 = vadd.f32 %v2990_v40, %v876_v46  ;;  %v2349_v49 = vpop.f32.mrb[2].mxu0  ;;  %v2381_v50 = vpop.f32.mrb[2].mxu1 }
 0x166   : > { %vm1271_vm0 = vcmp.gt.f32.partialorder %v1207_v43, 0.0  ;;  %v1335_v51 = vmul.f32 0.1, %v1207_v43  ;;  %vm1303_vm1 = vcmp.gt.f32.partialorder %v1239_v44, 0.0  ;;  %v1367_v52 = vmul.f32 0.1, %v1239_v44 }
 0x167   : > { %vm1269_vm2 = vcmp.gt.f32.partialorder %v1205_v47, 0.0  ;;  %v1333_v53 = vmul.f32 0.1, %v1205_v47  ;;  %vm1301_vm3 = vcmp.gt.f32.partialorder %v1237_v48, 0.0  ;;  %v1365_v54 = vmul.f32 0.1, %v1237_v48 }
 0x168   : > { %v1208_v55 = vadd.f32 %v2349_v49, %v2990_v40  ;;  %v1240_v56 = vadd.f32 %v2381_v50, %v2990_v40  ;;  %v751_v57 = vpop.f32.mrb[3].mxu0  ;;  %v879_v58 = vpop.f32.mrb[3].mxu1  ;;  %v1399_v59 = vsel %vm1271_vm0, %v1207_v43, %v1335_v51  ;;  %v1431_v60 = vsel %vm1303_vm1, %v1239_v44, %v1367_v52 }
 0x169   : > { %v1206_v61 = vadd.f32 %v2990_v40, %v751_v57  ;;  %v1238_v62 = vadd.f32 %v2990_v40, %v879_v58  ;;  %v1397_v3 = vsel %vm1269_vm2, %v1205_v47, %v1333_v53  ;;  %v1429_v4 = vsel %vm1301_vm3, %v1237_v48, %v1365_v54 }
 0x16a   : > { %vm1272_vm4 = vcmp.gt.f32.partialorder %v1208_v55, 0.0  ;;  %v1336_v63 = vmul.f32 0.1, %v1208_v55  ;;  %vm1304_vm5 = vcmp.gt.f32.partialorder %v1240_v56, 0.0  ;;  %v1368_v0 = vmul.f32 0.1, %v1240_v56 }
 0x16b   : > { %vm1270_vm6 = vcmp.gt.f32.partialorder %v1206_v61, 0.0  ;;  %v1334_v1 = vmul.f32 0.1, %v1206_v61  ;;  %vm1302_vm7 = vcmp.gt.f32.partialorder %v1238_v62, 0.0  ;;  %v1366_v2 = vmul.f32 0.1, %v1238_v62 }
 0x16c   : > { %v1400_v5 = vsel %vm1272_vm4, %v1208_v55, %v1336_v63  ;;  %v1432_v6 = vsel %vm1304_vm5, %v1240_v56, %v1368_v0  ;;  %v2352_v7 = vpop.f32.mrb[4].mxu0  ;;  %v2384_v8 = vpop.f32.mrb[4].mxu1 }
 0x16d   : > { %v2107_v9 = vpack.c.bf16 %v1400_v5, %v1399_v59  ;;  %v2187_v10 = vpack.c.bf16 %v1432_v6, %v1431_v60  ;;  %v1398_v11 = vsel %vm1270_vm6, %v1206_v61, %v1334_v1  ;;  %v1430_v12 = vsel %vm1302_vm7, %v1238_v62, %v1366_v2  ;;  %v764_v13 = vpop.f32.mrb[5].mxu0  ;;  %v892_v14 = vpop.f32.mrb[5].mxu1 }
 0x16e   : > { %v2102_v15 = vpack.c.bf16 %v1398_v11, %v1397_v3  ;;  %v2182_v16 = vpack.c.bf16 %v1430_v12, %v1429_v4  ;;  %v1211_v17 = vadd.f32 %v2352_v7, %v2990_v40  ;;  %v1243_v18 = vadd.f32 %v2384_v8, %v2990_v40  ;;  %v2353_v19 = vpop.f32.mrb[6].mxu0  ;;  %v2385_v20 = vpop.f32.mrb[6].mxu1 }
 0x16f   : > { %2259 = vst [vmem:[%s3006_s20 + $0x8] sm:$0xff] %v2107_v9   ;;  %2275 = vst [vmem:[%s3006_s20 + $0x88] sm:$0xff] %v2187_v10   ;;  %v1209_v21 = vadd.f32 %v2990_v40, %v764_v13  ;;  %v1241_v22 = vadd.f32 %v2990_v40, %v892_v14  ;;  %v1212_v23 = vadd.f32 %v2353_v19, %v2990_v40  ;;  %v767_v25 = vpop.f32.mrb[7].mxu0  ;;  %v895_v26 = vpop.f32.mrb[7].mxu1 }
 0x170   : > { %v1244_v24 = vadd.f32 %v2385_v20, %v2990_v40  ;;  %2103 = vst [vmem:[%s3006_s20] sm:$0xff] %v2102_v15   ;;  %2274 = vst [vmem:[%s3006_s20 + $0x80] sm:$0xff] %v2182_v16   ;;  %vm1275_vm8 = vcmp.gt.f32.partialorder %v1211_v17, 0.0  ;;  %v1339_v27 = vmul.f32 0.1, %v1211_v17  ;;  %vm1307_vm9 = vcmp.gt.f32.partialorder %v1243_v18, 0.0 }
 0x171   : > { %v1371_v28 = vmul.f32 0.1, %v1243_v18  ;;  %vm1273_vm10 = vcmp.gt.f32.partialorder %v1209_v21, 0.0  ;;  %v1337_v29 = vmul.f32 0.1, %v1209_v21  ;;  %vm1305_vm11 = vcmp.gt.f32.partialorder %v1241_v22, 0.0 }
 0x172   : > { %v1369_v30 = vmul.f32 0.1, %v1241_v22  ;;  %v1403_v31 = vsel %vm1275_vm8, %v1211_v17, %v1339_v27  ;;  %vm1276_vm12 = vcmp.gt.f32.partialorder %v1212_v23, 0.0  ;;  %v1340_v33 = vmul.f32 0.1, %v1212_v23 }
 0x173   : > { %v1435_v32 = vsel %vm1307_vm9, %v1243_v18, %v1371_v28  ;;  %v1401_v34 = vsel %vm1273_vm10, %v1209_v21, %v1337_v29  ;;  %vm1308_vm13 = vcmp.gt.f32.partialorder %v1244_v24, 0.0  ;;  %v1372_v36 = vmul.f32 0.1, %v1244_v24  ;;  %v2356_v37 = vpop.f32.mrb[8].mxu0  ;;  %v2388_v38 = vpop.f32.mrb[8].mxu1 }
 0x174   : > { %v1433_v35 = vsel %vm1305_vm11, %v1241_v22, %v1369_v30  ;;  %v1404_v39 = vsel %vm1276_vm12, %v1212_v23, %v1340_v33  ;;  %v1210_v41 = vadd.f32 %v2990_v40, %v767_v25  ;;  %v1242_v42 = vadd.f32 %v2990_v40, %v895_v26  ;;  %v780_v44 = vpop.f32.mrb[9].mxu0  ;;  %v908_v45 = vpop.f32.mrb[9].mxu1 }
 0x175   : > { %v1215_v43 = vadd.f32 %v2356_v37, %v2990_v40  ;;  %v2117_v46 = vpack.c.bf16 %v1404_v39, %v1403_v31  ;;  %v1436_v47 = vsel %vm1308_vm13, %v1244_v24, %v1372_v36  ;;  %v1247_v48 = vadd.f32 %v2388_v38, %v2990_v40  ;;  %v2357_v50 = vpop.f32.mrb[10].mxu0  ;;  %v2389_v51 = vpop.f32.mrb[10].mxu1 }
 0x176   : > { %v1213_v49 = vadd.f32 %v2990_v40, %v780_v44  ;;  %v2197_v52 = vpack.c.bf16 %v1436_v47, %v1435_v32  ;;  %vm1274_vm14 = vcmp.gt.f32.partialorder %v1210_v41, 0.0  ;;  %v1338_v53 = vmul.f32 0.1, %v1210_v41  ;;  %v783_v54 = vpop.f32.mrb[11].mxu0  ;;  %v911_v55 = vpop.f32.mrb[11].mxu1 }
 0x177   : > { %vm1306_vm15 = vcmp.gt.f32.partialorder %v1242_v42, 0.0  ;;  %2261 = vst [vmem:[%s3006_s20 + $0x18] sm:$0xff] %v2117_v46   ;;  %v1370_v56 = vmul.f32 0.1, %v1242_v42  ;;  %vm1279_vm0 = vcmp.gt.f32.partialorder %v1215_v43, 0.0  ;;  %vm1311_vm1 = vcmp.gt.f32.partialorder %v1247_v48, 0.0 }
 0x178   : > { %v1343_v57 = vmul.f32 0.1, %v1215_v43  ;;  %2277 = vst [vmem:[%s3006_s20 + $0x98] sm:$0xff] %v2197_v52   ;;  %v1402_v58 = vsel %vm1274_vm14, %v1210_v41, %v1338_v53  ;;  %v1375_v59 = vmul.f32 0.1, %v1247_v48  ;;  %vm1277_vm2 = vcmp.gt.f32.partialorder %v1213_v49, 0.0 }
 0x179   : > { %v1341_v60 = vmul.f32 0.1, %v1213_v49  ;;  %v2112_v61 = vpack.c.bf16 %v1402_v58, %v1401_v34  ;;  %v1434_v62 = vsel %vm1306_vm15, %v1242_v42, %v1370_v56  ;;  %v1245_v0 = vadd.f32 %v2990_v40, %v908_v45 }
 0x17a   : > { %v1407_v63 = vsel %vm1279_vm0, %v1215_v43, %v1343_v57  ;;  %v2192_v1 = vpack.c.bf16 %v1434_v62, %v1433_v35  ;;  %v1439_v2 = vsel %vm1311_vm1, %v1247_v48, %v1375_v59  ;;  %v1216_v4 = vadd.f32 %v2357_v50, %v2990_v40 }
 0x17b   : > { %v1405_v3 = vsel %vm1277_vm2, %v1213_v49, %v1341_v60  ;;  %2260 = vst [vmem:[%s3006_s20 + $0x10] sm:$0xff] %v2112_v61   ;;  %vm1309_vm3 = vcmp.gt.f32.partialorder %v1245_v0, 0.0  ;;  %v1373_v5 = vmul.f32 0.1, %v1245_v0  ;;  %v1248_v6 = vadd.f32 %v2389_v51, %v2990_v40  ;;  %v2360_v8 = vpop.f32.mrb[12].mxu0  ;;  %v2392_v9 = vpop.f32.mrb[12].mxu1 }
 0x17c   : > { %v1214_v7 = vadd.f32 %v2990_v40, %v783_v54  ;;  %2276 = vst [vmem:[%s3006_s20 + $0x90] sm:$0xff] %v2192_v1   ;;  %vm1280_vm4 = vcmp.gt.f32.partialorder %v1216_v4, 0.0  ;;  %v1344_v10 = vmul.f32 0.1, %v1216_v4  ;;  %v1246_v11 = vadd.f32 %v2990_v40, %v911_v55  ;;  %v796_v13 = vpop.f32.mrb[13].mxu0  ;;  %v924_v14 = vpop.f32.mrb[13].mxu1 }
 0x17d   : > { %v1219_v12 = vadd.f32 %v2360_v8, %v2990_v40  ;;  %v1437_v15 = vsel %vm1309_vm3, %v1245_v0, %v1373_v5  ;;  %vm1312_vm5 = vcmp.gt.f32.partialorder %v1248_v6, 0.0  ;;  %v1376_v16 = vmul.f32 0.1, %v1248_v6  ;;  %v2361_v17 = vpop.f32.mrb[14].mxu0  ;;  %v2393_v18 = vpop.f32.mrb[14].mxu1 }
 0x17e   : > { %vm1278_vm6 = vcmp.gt.f32.partialorder %v1214_v7, 0.0  ;;  %v1408_v19 = vsel %vm1280_vm4, %v1216_v4, %v1344_v10  ;;  %v1342_v20 = vmul.f32 0.1, %v1214_v7  ;;  %vm1310_vm7 = vcmp.gt.f32.partialorder %v1246_v11, 0.0  ;;  %v799_v22 = vpop.f32.mrb[15].mxu0  ;;  %v927_v26 = vpop.f32.mrb[15].mxu1 }
 0x17f   : > { %v1374_v21 = vmul.f32 0.1, %v1246_v11  ;;  %v2127_v23 = vpack.c.bf16 %v1408_v19, %v1407_v63  ;;  %v1440_v24 = vsel %vm1312_vm5, %v1248_v6, %v1376_v16  ;;  %vm1283_vm8 = vcmp.gt.f32.partialorder %v1219_v12, 0.0 }
 0x180   : > { %v1347_v25 = vmul.f32 0.1, %v1219_v12  ;;  %v2207_v27 = vpack.c.bf16 %v1440_v24, %v1439_v2  ;;  %v1406_v28 = vsel %vm1278_vm6, %v1214_v7, %v1342_v20  ;;  %v1251_v30 = vadd.f32 %v2392_v9, %v2990_v40 }
 0x181   : > { %v1438_v29 = vsel %vm1310_vm7, %v1246_v11, %v1374_v21  ;;  %2263 = vst [vmem:[%s3006_s20 + $0x28] sm:$0xff] %v2127_v23   ;;  %v2122_v31 = vpack.c.bf16 %v1406_v28, %v1405_v3  ;;  %v1217_v34 = vadd.f32 %v2990_v40, %v796_v13  ;;  %v1249_v36 = vadd.f32 %v2990_v40, %v924_v14 }
 0x182   : > { %v2202_v32 = vpack.c.bf16 %v1438_v29, %v1437_v15  ;;  %v1411_v33 = vsel %vm1283_vm8, %v1219_v12, %v1347_v25  ;;  %2279 = vst [vmem:[%s3006_s20 + $0xa8] sm:$0xff] %v2207_v27   ;;  %vm1315_vm9 = vcmp.gt.f32.partialorder %v1251_v30, 0.0  ;;  %v1379_v35 = vmul.f32 0.1, %v1251_v30 }
 0x183   : > { %v1220_v37 = vadd.f32 %v2361_v17, %v2990_v40  ;;  %2262 = vst [vmem:[%s3006_s20 + $0x20] sm:$0xff] %v2122_v31   ;;  %vm1281_vm10 = vcmp.gt.f32.partialorder %v1217_v34, 0.0  ;;  %v1345_v38 = vmul.f32 0.1, %v1217_v34  ;;  %v1252_v39 = vadd.f32 %v2393_v18, %v2990_v40  ;;  %v2364_v42 = vpop.f32.mrb[16].mxu0  ;;  %v2396_v43 = vpop.f32.mrb[16].mxu1 }
 0x184   : > { %2278 = vst [vmem:[%s3006_s20 + $0xa0] sm:$0xff] %v2202_v32   ;;  %v1218_v41 = vadd.f32 %v2990_v40, %v799_v22  ;;  %v1443_v44 = vsel %vm1315_vm9, %v1251_v30, %v1379_v35  ;;  %vm1313_vm11 = vcmp.gt.f32.partialorder %v1249_v36, 0.0  ;;  %v1377_v45 = vmul.f32 0.1, %v1249_v36  ;;  %v812_v46 = vpop.f32.mrb[17].mxu0  ;;  %v940_v47 = vpop.f32.mrb[17].mxu1 }
 0x185   : > { %vm1284_vm12 = vcmp.gt.f32.partialorder %v1220_v37, 0.0  ;;  %v1409_v48 = vsel %vm1281_vm10, %v1217_v34, %v1345_v38  ;;  %v1348_v49 = vmul.f32 0.1, %v1220_v37  ;;  %vm1316_vm13 = vcmp.gt.f32.partialorder %v1252_v39, 0.0  ;;  %v2365_v51 = vpop.f32.mrb[18].mxu0  ;;  %v2397_v55 = vpop.f32.mrb[18].mxu1 }
 0x186   : > { %v1380_v50 = vmul.f32 0.1, %v1252_v39  ;;  %v1441_v52 = vsel %vm1313_vm11, %v1249_v36, %v1377_v45  ;;  %vm1282_vm14 = vcmp.gt.f32.partialorder %v1218_v41, 0.0  ;;  %v1346_v53 = vmul.f32 0.1, %v1218_v41  ;;  %v815_v56 = vpop.f32.mrb[19].mxu0 }
 0x187   : > { %v1250_v54 = vadd.f32 %v2990_v40, %v927_v26  ;;  %v1412_v57 = vsel %vm1284_vm12, %v1220_v37, %v1348_v49  ;;  %v1223_v59 = vadd.f32 %v2364_v42, %v2990_v40  ;;  %v1255_v60 = vadd.f32 %v2396_v43, %v2990_v40  ;;  %v943_v61 = vpop.f32.mrb[19].mxu1 }
 0x188   : > { %v1444_v58 = vsel %vm1316_vm13, %v1252_v39, %v1380_v50  ;;  %v2137_v62 = vpack.c.bf16 %v1412_v57, %v1411_v33  ;;  %v1410_v0 = vsel %vm1282_vm14, %v1218_v41, %v1346_v53  ;;  %v1221_v5 = vadd.f32 %v2990_v40, %v812_v46 }
 0x189   : > { %v2217_v63 = vpack.c.bf16 %v1444_v58, %v1443_v44  ;;  %vm1314_vm15 = vcmp.gt.f32.partialorder %v1250_v54, 0.0  ;;  %v2132_v1 = vpack.c.bf16 %v1410_v0, %v1409_v48  ;;  %v1378_v2 = vmul.f32 0.1, %v1250_v54 }
 0x18a   : > { %vm1287_vm0 = vcmp.gt.f32.partialorder %v1223_v59, 0.0  ;;  %v1351_v3 = vmul.f32 0.1, %v1223_v59  ;;  %2265 = vst [vmem:[%s3006_s20 + $0x38] sm:$0xff] %v2137_v62   ;;  %vm1319_vm1 = vcmp.gt.f32.partialorder %v1255_v60, 0.0  ;;  %v1253_v6 = vadd.f32 %v2990_v40, %v940_v47 }
 0x18b   : > { %2281 = vst [vmem:[%s3006_s20 + $0xb8] sm:$0xff] %v2217_v63   ;;  %v1383_v4 = vmul.f32 0.1, %v1255_v60  ;;  %2264 = vst [vmem:[%s3006_s20 + $0x30] sm:$0xff] %v2132_v1   ;;  %v1442_v7 = vsel %vm1314_vm15, %v1250_v54, %v1378_v2  ;;  %v1224_v9 = vadd.f32 %v2365_v51, %v2990_v40  ;;  %v1256_v10 = vadd.f32 %v2397_v55, %v2990_v40  ;;  %v2368_v11 = vpop.f32.mrb[20].mxu0  ;;  %v2400_v12 = vpop.f32.mrb[20].mxu1 }
 0x18c   : > { %v1415_v8 = vsel %vm1287_vm0, %v1223_v59, %v1351_v3  ;;  %v2212_v13 = vpack.c.bf16 %v1442_v7, %v1441_v52  ;;  %vm1285_vm2 = vcmp.gt.f32.partialorder %v1221_v5, 0.0  ;;  %v1349_v15 = vmul.f32 0.1, %v1221_v5  ;;  %v828_v16 = vpop.f32.mrb[21].mxu0  ;;  %v956_v17 = vpop.f32.mrb[21].mxu1 }
 0x18d   : > { %v1447_v14 = vsel %vm1319_vm1, %v1255_v60, %v1383_v4  ;;  %vm1317_vm3 = vcmp.gt.f32.partialorder %v1253_v6, 0.0  ;;  %v1381_v18 = vmul.f32 0.1, %v1253_v6  ;;  %vm1288_vm4 = vcmp.gt.f32.partialorder %v1224_v9, 0.0  ;;  %v2369_v23 = vpop.f32.mrb[22].mxu0  ;;  %v2401_v24 = vpop.f32.mrb[22].mxu1 }
 0x18e   : > { %v1352_v19 = vmul.f32 0.1, %v1224_v9  ;;  %2280 = vst [vmem:[%s3006_s20 + $0xb0] sm:$0xff] %v2212_v13   ;;  %v1413_v20 = vsel %vm1285_vm2, %v1221_v5, %v1349_v15  ;;  %vm1320_vm5 = vcmp.gt.f32.partialorder %v1256_v10, 0.0  ;;  %v1384_v21 = vmul.f32 0.1, %v1256_v10 }
 0x18f   : > { %v1222_v22 = vadd.f32 %v2990_v40, %v815_v56  ;;  %v1445_v25 = vsel %vm1317_vm3, %v1253_v6, %v1381_v18  ;;  %v1254_v27 = vadd.f32 %v2990_v40, %v943_v61  ;;  %v1227_v28 = vadd.f32 %v2368_v11, %v2990_v40  ;;  %v831_v29 = vpop.f32.mrb[23].mxu0  ;;  %v959_v30 = vpop.f32.mrb[23].mxu1 }
 0x190   : > { %v1416_v26 = vsel %vm1288_vm4, %v1224_v9, %v1352_v19  ;;  %v1448_v32 = vsel %vm1320_vm5, %v1256_v10, %v1384_v21  ;;  %v1259_v38 = vadd.f32 %v2400_v12, %v2990_v40  ;;  %v1225_v39 = vadd.f32 %v2990_v40, %v828_v16 }
 0x191   : > { %v2147_v31 = vpack.c.bf16 %v1416_v26, %v1415_v8  ;;  %vm1286_vm6 = vcmp.gt.f32.partialorder %v1222_v22, 0.0  ;;  %v1350_v33 = vmul.f32 0.1, %v1222_v22  ;;  %v2227_v34 = vpack.c.bf16 %v1448_v32, %v1447_v14 }
 0x192   : > { %vm1318_vm7 = vcmp.gt.f32.partialorder %v1254_v27, 0.0  ;;  %v1382_v35 = vmul.f32 0.1, %v1254_v27  ;;  %vm1291_vm8 = vcmp.gt.f32.partialorder %v1227_v28, 0.0  ;;  %v1355_v37 = vmul.f32 0.1, %v1227_v28 }
 0x193   : > { %2267 = vst [vmem:[%s3006_s20 + $0x48] sm:$0xff] %v2147_v31   ;;  %v1414_v36 = vsel %vm1286_vm6, %v1222_v22, %v1350_v33  ;;  %2283 = vst [vmem:[%s3006_s20 + $0xc8] sm:$0xff] %v2227_v34   ;;  %v1257_v43 = vadd.f32 %v2990_v40, %v956_v17  ;;  %v1228_v44 = vadd.f32 %v2369_v23, %v2990_v40  ;;  %v2372_v45 = vpop.f32.mrb[24].mxu0  ;;  %v2404_v46 = vpop.f32.mrb[24].mxu1  ;;  %vm1323_vm9 = vcmp.gt.f32.partialorder %v1259_v38, 0.0 }
 0x194   : > { %v2142_v41 = vpack.c.bf16 %v1414_v36, %v1413_v20  ;;  %v1446_v42 = vsel %vm1318_vm7, %v1254_v27, %v1382_v35  ;;  %v1387_v48 = vmul.f32 0.1, %v1259_v38  ;;  %v844_v49 = vpop.f32.mrb[25].mxu0  ;;  %v972_v50 = vpop.f32.mrb[25].mxu1  ;;  %v1419_v51 = vsel %vm1291_vm8, %v1227_v28, %v1355_v37 }
 0x195   : > { %v2222_v47 = vpack.c.bf16 %v1446_v42, %v1445_v25  ;;  %vm1289_vm10 = vcmp.gt.f32.partialorder %v1225_v39, 0.0  ;;  %v1353_v52 = vmul.f32 0.1, %v1225_v39  ;;  %v1385_v53 = vmul.f32 0.1, %v1257_v43  ;;  %v2373_v56 = vpop.f32.mrb[26].mxu0 }
 0x196   : > { %2266 = vst [vmem:[%s3006_s20 + $0x40] sm:$0xff] %v2142_v41   ;;  %vm1321_vm11 = vcmp.gt.f32.partialorder %v1257_v43, 0.0  ;;  %vm1292_vm12 = vcmp.gt.f32.partialorder %v1228_v44, 0.0  ;;  %v1356_v54 = vmul.f32 0.1, %v1228_v44  ;;  %v1260_v55 = vadd.f32 %v2401_v24, %v2990_v40  ;;  %v2405_v57 = vpop.f32.mrb[26].mxu1 }
 0x197   : > { %2282 = vst [vmem:[%s3006_s20 + $0xc0] sm:$0xff] %v2222_v47   ;;  %v1451_v58 = vsel %vm1323_vm9, %v1259_v38, %v1387_v48  ;;  %v1417_v59 = vsel %vm1289_vm10, %v1225_v39, %v1353_v52  ;;  %v1226_v60 = vadd.f32 %v2990_v40, %v831_v29  ;;  %v1258_v61 = vadd.f32 %v2990_v40, %v959_v30  ;;  %v847_v62 = vpop.f32.mrb[27].mxu0  ;;  %v975_v63 = vpop.f32.mrb[27].mxu1 }
 0x198   : > { %v1420_v0 = vsel %vm1292_vm12, %v1228_v44, %v1356_v54  ;;  %vm1324_vm13 = vcmp.gt.f32.partialorder %v1260_v55, 0.0  ;;  %v1388_v1 = vmul.f32 0.1, %v1260_v55  ;;  %v1231_v2 = vadd.f32 %v2372_v45, %v2990_v40 }
 0x199   : > { %v2157_v3 = vpack.c.bf16 %v1420_v0, %v1419_v51  ;;  %vm1290_vm14 = vcmp.gt.f32.partialorder %v1226_v60, 0.0  ;;  %v1354_v4 = vmul.f32 0.1, %v1226_v60  ;;  %vm1322_vm15 = vcmp.gt.f32.partialorder %v1258_v61, 0.0 }
 0x19a   : > { %v1452_v5 = vsel %vm1324_vm13, %v1260_v55, %v1388_v1  ;;  %v1386_v6 = vmul.f32 0.1, %v1258_v61  ;;  %vm1295_vm0 = vcmp.gt.f32.partialorder %v1231_v2, 0.0  ;;  %v1359_v7 = vmul.f32 0.1, %v1231_v2 }
 0x19b   : > { %2269 = vst [vmem:[%s3006_s20 + $0x58] sm:$0xff] %v2157_v3   ;;  %v2237_v8 = vpack.c.bf16 %v1452_v5, %v1451_v58  ;;  %v1418_v9 = vsel %vm1290_vm14, %v1226_v60, %v1354_v4  ;;  %v1263_v10 = vadd.f32 %v2404_v46, %v2990_v40  ;;  %v1229_v11 = vadd.f32 %v2990_v40, %v844_v49  ;;  %v2376_v12 = vpop.f32.mrb[28].mxu0  ;;  %v2408_v13 = vpop.f32.mrb[28].mxu1 }
 0x19c   : > { %v1449_v14 = vsel %vm1321_vm11, %v1257_v43, %v1385_v53  ;;  %v2152_v15 = vpack.c.bf16 %v1418_v9, %v1417_v59  ;;  %v1450_v16 = vsel %vm1322_vm15, %v1258_v61, %v1386_v6  ;;  %v1261_v17 = vadd.f32 %v2990_v40, %v972_v50  ;;  %v860_v18 = vpop.f32.mrb[29].mxu0  ;;  %v988_v19 = vpop.f32.mrb[29].mxu1 }
 0x19d   : > { %2285 = vst [vmem:[%s3006_s20 + $0xd8] sm:$0xff] %v2237_v8   ;;  %v2232_v20 = vpack.c.bf16 %v1450_v16, %v1449_v14  ;;  %vm1327_vm1 = vcmp.gt.f32.partialorder %v1263_v10, 0.0  ;;  %v1391_v21 = vmul.f32 0.1, %v1263_v10  ;;  %vm1293_vm2 = vcmp.gt.f32.partialorder %v1229_v11, 0.0  ;;  %v2377_v22 = vpop.f32.mrb[30].mxu0 }
 0x19e   : > { %v2409_v23 = vpop.f32.mrb[30].mxu1  ;;  %2268 = vst [vmem:[%s3006_s20 + $0x50] sm:$0xff] %v2152_v15   ;;  %v1423_v24 = vsel %vm1295_vm0, %v1231_v2, %v1359_v7  ;;  %v1357_v25 = vmul.f32 0.1, %v1229_v11  ;;  %vm1325_vm3 = vcmp.gt.f32.partialorder %v1261_v17, 0.0  ;;  %v1232_v26 = vadd.f32 %v2373_v56, %v2990_v40  ;;  %v863_v27 = vpop.f32.mrb[31].mxu0 }
 0x19f   : > { %2284 = vst [vmem:[%s3006_s20 + $0xd0] sm:$0xff] %v2232_v20   ;;  %v1389_v28 = vmul.f32 0.1, %v1261_v17  ;;  %v1264_v29 = vadd.f32 %v2405_v57, %v2990_v40  ;;  %v1230_v30 = vadd.f32 %v2990_v40, %v847_v62  ;;  %v1262_v31 = vadd.f32 %v2990_v40, %v975_v63  ;;  %v991_v32 = vpop.f32.mrb[31].mxu1 }
 0x1a0   : > { %v1455_v33 = vsel %vm1327_vm1, %v1263_v10, %v1391_v21  ;;  %v1421_v34 = vsel %vm1293_vm2, %v1229_v11, %v1357_v25  ;;  %vm1296_vm4 = vcmp.gt.f32.partialorder %v1232_v26, 0.0  ;;  %v1360_v35 = vmul.f32 0.1, %v1232_v26 }
 0x1a1   : > { %vm1328_vm5 = vcmp.gt.f32.partialorder %v1264_v29, 0.0  ;;  %v1392_v36 = vmul.f32 0.1, %v1264_v29  ;;  %vm1294_vm6 = vcmp.gt.f32.partialorder %v1230_v30, 0.0  ;;  %v1358_v37 = vmul.f32 0.1, %v1230_v30 }
 0x1a2   : > { %v1424_v38 = vsel %vm1296_vm4, %v1232_v26, %v1360_v35  ;;  %vm1326_vm7 = vcmp.gt.f32.partialorder %v1262_v31, 0.0  ;;  %v1390_v39 = vmul.f32 0.1, %v1262_v31  ;;  %v1235_v41 = vadd.f32 %v2376_v12, %v2990_v40 }
 0x1a3   : > { %v2167_v42 = vpack.c.bf16 %v1424_v38, %v1423_v24  ;;  %v1456_v43 = vsel %vm1328_vm5, %v1264_v29, %v1392_v36  ;;  %v1422_v44 = vsel %vm1294_vm6, %v1230_v30, %v1358_v37  ;;  %v1267_v45 = vadd.f32 %v2408_v13, %v2990_v40 }
 0x1a4   : > { %v1453_v46 = vsel %vm1325_vm3, %v1261_v17, %v1389_v28  ;;  %v2247_v47 = vpack.c.bf16 %v1456_v43, %v1455_v33  ;;  %v2162_v48 = vpack.c.bf16 %v1422_v44, %v1421_v34  ;;  %v1454_v49 = vsel %vm1326_vm7, %v1262_v31, %v1390_v39 }
 0x1a5   : > { %2271 = vst [vmem:[%s3006_s20 + $0x68] sm:$0xff] %v2167_v42   ;;  %v2242_v50 = vpack.c.bf16 %v1454_v49, %v1453_v46  ;;  %vm1299_vm8 = vcmp.gt.f32.partialorder %v1235_v41, 0.0  ;;  %v1363_v51 = vmul.f32 0.1, %v1235_v41  ;;  %v1395_v52 = vmul.f32 0.1, %v1267_v45 }
 0x1a6   : > { %2287 = vst [vmem:[%s3006_s20 + $0xe8] sm:$0xff] %v2247_v47   ;;  %2270 = vst [vmem:[%s3006_s20 + $0x60] sm:$0xff] %v2162_v48   ;;  %v1233_v53 = vadd.f32 %v2990_v40, %v860_v18  ;;  %v1265_v54 = vadd.f32 %v2990_v40, %v988_v19  ;;  %v1236_v55 = vadd.f32 %v2377_v22, %v2990_v40  ;;  %vm1331_vm9 = vcmp.gt.f32.partialorder %v1267_v45, 0.0 }
 0x1a7   : > { %v1268_v56 = vadd.f32 %v2409_v23, %v2990_v40  ;;  %2286 = vst [vmem:[%s3006_s20 + $0xe0] sm:$0xff] %v2242_v50   ;;  %v1234_v57 = vadd.f32 %v2990_v40, %v863_v27  ;;  %v1266_v58 = vadd.f32 %v2990_v40, %v991_v32  ;;  %v1427_v59 = vsel %vm1299_vm8, %v1235_v41, %v1363_v51 }
 0x1a8   : > { %vm1297_vm10 = vcmp.gt.f32.partialorder %v1233_v53, 0.0  ;;  %v1361_v60 = vmul.f32 0.1, %v1233_v53  ;;  %v1393_v61 = vmul.f32 0.1, %v1265_v54  ;;  %vm1300_vm11 = vcmp.gt.f32.partialorder %v1236_v55, 0.0 }
 0x1a9   : > { %v1364_v62 = vmul.f32 0.1, %v1236_v55  ;;  %vm1332_vm12 = vcmp.gt.f32.partialorder %v1268_v56, 0.0  ;;  %v1396_v63 = vmul.f32 0.1, %v1268_v56  ;;  %v1459_v0 = vsel %vm1331_vm9, %v1267_v45, %v1395_v52 }
 0x1aa   : > { %vm1329_vm13 = vcmp.gt.f32.partialorder %v1265_v54, 0.0  ;;  %vm1298_vm14 = vcmp.gt.f32.partialorder %v1234_v57, 0.0  ;;  %v1362_v1 = vmul.f32 0.1, %v1234_v57  ;;  %vm1330_vm15 = vcmp.gt.f32.partialorder %v1266_v58, 0.0 }
 0x1ab   : > { %v1428_v2 = vsel %vm1300_vm11, %v1236_v55, %v1364_v62  ;;  %v1460_v3 = vsel %vm1332_vm12, %v1268_v56, %v1396_v63  ;;  %v1394_v40 = vmul.f32 0.1, %v1266_v58  ;;  %v1425_v4 = vsel %vm1297_vm10, %v1233_v53, %v1361_v60 }
 0x1ac   : > { %v2177_v5 = vpack.c.bf16 %v1428_v2, %v1427_v59  ;;  %v2257_v6 = vpack.c.bf16 %v1460_v3, %v1459_v0  ;;  %v1426_v7 = vsel %vm1298_vm14, %v1234_v57, %v1362_v1  ;;  %v1457_v8 = vsel %vm1329_vm13, %v1265_v54, %v1393_v61 }
 0x1ad   : > { %v2172_v9 = vpack.c.bf16 %v1426_v7, %v1425_v4  ;;  %v1458_v10 = vsel %vm1330_vm15, %v1266_v58, %v1394_v40 }
 0x1ae   : > { %2273 = vst [vmem:[%s3006_s20 + $0x78] sm:$0xff] %v2177_v5   ;;  %2289 = vst [vmem:[%s3006_s20 + $0xf8] sm:$0xff] %v2257_v6   ;;  %v2252_v11 = vpack.c.bf16 %v1458_v10, %v1457_v8 }
 0x1af   : > { %2272 = vst [vmem:[%s3006_s20 + $0x70] sm:$0xff] %v2172_v9  }
 0x1b0   : > { %2288 = vst [vmem:[%s3006_s20 + $0xf0] sm:$0xff] %v2252_v11  }
 0x1b1   : > { %2652 = shalt.err (!%p2649_p5)
}
 0x1b2   : > { %s2653_s21 = scalar_lea.hbm %s3103_s18, 4096  ;;  %s2657_s5 = scalar_lea.hbm %s3160_s3, 65536 }
 0x1b3   : > { %p2654_p9 = scmp.ne.s32.totalorder %s3103_s18, %s2653_s21  ;;  %p2658_p3 = scmp.lt.u32.totalorder %s3103_s18, %s3160_s3 }
 0x1b4   : > { %p2659_p7 = scmp.lt.u32.totalorder %s2657_s5, %s2653_s21  ;;  %p2661_p2 = scmp.lt.u32.totalorder %s2653_s21, %s3103_s18 }
 0x1b5   : > { %p2655_p12 = pnand %p2654_p9, %p2884_p11 }
 0x1b6   : > { %p2660_p10 = por %p2659_p7, %p2658_p3 }
 0x1b7   : > { %p2656_p1 = pneg %p2655_p12 }
 0x1b8   : > { %p2662_p4 = por %p2661_p2, %p2660_p10 }
 0x1ba   : > { %p2663_p6 = pnand %p2662_p4, %p2656_p1 }
 0x1bc   : > { %2666 = shalt.err (!%p2663_p6)
}
 0x1bd   : > { %s2733_s20 = smov 64   ;;  %s2734_s22 = smov 4  }
 0x1be   : > { %2436 = dma.vmem_to_hbm [thread:$0]  (%p2884_p11), %s3105_s24, 4096, %s3103_s18, %s1782_s26, %s2733_s20, %s2733_s20, %s2734_s22  }
 0x1bf PF: > { %p2458_p8 = scmp.ge.s32.totalorder %s2725_s17, 2  ;;  %s1811_s11 = sand.u32 1, %s2705_s12  }
 0x1c0   : > { %p3177_p13 = scmp.ne.s32.totalorder %s3168_s23, 0  ;;  %s1812_s15 = scalar_lea.sflag [#allocation5], %s1811_s11 }
 0x1c2   : > { %p2450_p0 = pnand %p2458_p8, %p3177_p13 }
 0x1c4   : > { %2700 = dma.done.wait (!%p2450_p0), %s1812_s15, 4096  }
 0x1c5   : > { %2702 = vsyncadd (!%p2450_p0), %s1812_s15, 4294963200  ;;  %s20_s17 = sadd.s32 1, %s2725_s17   ;;  %s3178_s12 = smov %s2709_s13 }
 0x1c6   : > { %p17_p5 = scmp.ge.s32.totalorder %s20_s17, 18   ;;  %s3179_s13 = smov %s2713_s14 }
 0x1c7   : > { %s3180_s14 = smov %s2893_s6  ;;  %s3181_s15 = smov %s2721_s16 }
 0x1c8   : > { %s3182_s16 = smov %s3184_s25  ;;  %19 = sbr.rel (!%p17_p5) target bundleno = 7 (0x7), region = 95 }
 0x1cf   :  { %1817 = vsyncpa [#allocation4], 1 }
 0x1d0   :  { %1819 = vsyncpa [#allocation4 + $0x1], 1 }
 0x1d1   :  { %1820 = vsyncpa [#allocation7], 1 }
 0x1d2   :  { %1821 = vsyncpa [#allocation5], 1 }
 0x1d3   :  { %1823 = vsyncpa [#allocation5 + $0x1], 1 }

</bundles_post_ra>
